<compile_context>
chip_gen: v5e
topology: v5e:2x2
jax: 0.10.0
libtpu: 0.0.40
codegen_flags: <defaults>
</compile_context>

<pallas_src>
import functools

import jax
import jax.numpy as jnp
from jax.experimental import pallas as pl
from jax.experimental.pallas import tpu as pltpu


def _mha_kernel(x_ref, wqkv_ref, bqkv_ref, wo_ref, bo_ref, o_ref, *,
                num_heads, head_size, compute_dtype):
    """One batch element per grid step; heads batched inside.

    x_ref    : (S, E)        activations for this batch element (compute_dtype)
    wqkv_ref : (H, E, 3*Dh)  per-head fused Q|K|V weights (q pre-scaled)
    bqkv_ref : (H, 1, 3*Dh)  per-head fused biases (f32)
    wo_ref   : (H, Dh, E)    output projection, split by head rows
    bo_ref   : (1, E)
    o_ref    : (S, E)
    """
    H, Dh = num_heads, head_size
    S, E = x_ref.shape

    x = x_ref[...]                                     # (S, E)
    xb = jnp.broadcast_to(x, (H, S, E))                # heads -> leading batch dim

    # Head-batched QKV projection, one batched MXU contraction, f32 accumulation.
    qkv = jnp.einsum('hse,hef->hsf', xb, wqkv_ref[...],
                     preferred_element_type=jnp.float32) + bqkv_ref[...]  # (H,S,3Dh)

    q = qkv[..., 0 * Dh:1 * Dh].astype(compute_dtype)  # scale already folded in
    k = qkv[..., 1 * Dh:2 * Dh].astype(compute_dtype)
    v = qkv[..., 2 * Dh:3 * Dh].astype(compute_dtype)

    # All heads in one batched contraction (contraction on last axes; XLU idle).
    s = jnp.einsum('hqd,hkd->hqk', q, k,
                   preferred_element_type=jnp.float32)                    # (H,S,S)

    # Exact softmax over keys, f32 math.
    m = jnp.max(s, axis=-1, keepdims=True)
    p = jnp.exp(s - m)
    attn = (p / jnp.sum(p, axis=-1, keepdims=True)).astype(compute_dtype)

    ctx = jnp.einsum('hqk,hkd->hqd', attn, v,
                     preferred_element_type=jnp.float32)                  # (H,S,Dh)

    # Output projection directly from registers (no VMEM scratch, no concat,
    # no masked column stores):  out = sum_h ctx_h @ Wo_h.
    outp = jnp.einsum('hqd,hde->hqe', ctx.astype(compute_dtype), wo_ref[...],
                      preferred_element_type=jnp.float32)                 # (H,S,E)
    out = outp[0]
    for h in range(1, H):                              # cheap leading-dim reduce
        out = out + outp[h]
    out = out + bo_ref[...]                            # (S,E) + (1,E)

    o_ref[...] = out.astype(o_ref.dtype)


def prepare_mha_params(params, *, num_heads, compute_dtype=jnp.float32):
    """One-time parameter preparation (hoisted out of the per-call path).

    Folds the 1/sqrt(embed_size) attention scale into the Q projection,
    regroups the combined per-head weights head-major, and casts the matmul
    operands to compute_dtype (biases stay f32: they add into f32 accums).
    """
    E = params["wq"].shape[0]
    assert E % num_heads == 0
    Dh = E // num_heads
    # NOTE: the PyTorch module scales energy by sqrt(embed_size), NOT sqrt(head_size).
    inv_scale = 1.0 / (float(E) ** 0.5)

    def cols_per_head(w):          # (E, H*Dh) -> (H, E, Dh)
        return w.reshape(E, num_heads, Dh).transpose(1, 0, 2)

    def bias_per_head(b):          # (1, H*Dh) -> (H, 1, Dh)
        return b.reshape(num_heads, Dh)[:, None, :]

    wqkv = jnp.concatenate([cols_per_head(params["wq"] * inv_scale),
                            cols_per_head(params["wk"]),
                            cols_per_head(params["wv"])], axis=-1)        # (H,E,3Dh)
    bqkv = jnp.concatenate([bias_per_head(params["bq"] * inv_scale),
                            bias_per_head(params["bk"]),
                            bias_per_head(params["bv"])], axis=-1)        # (H,1,3Dh)
    wo = params["wo"].reshape(num_heads, Dh, E)                           # (H,Dh,E)

    return {
        "wqkv": wqkv.astype(compute_dtype),
        "bqkv": bqkv.astype(jnp.float32),
        "wo": wo.astype(compute_dtype),
        "bo": params["bo"].astype(jnp.float32),
    }


def multi_head_attention(x, prep, *, num_heads, compute_dtype=jnp.float32):
    """x: (N, S, E). prep: output of prepare_mha_params.

    compute_dtype: MXU operand dtype (use jnp.bfloat16 on v6e/v7x for ~2x MXU
    throughput; accumulation and softmax stay f32).  Default f32 for exactness.
    """
    N, S, E = x.shape
    H = num_heads
    assert E % H == 0
    Dh = E // H
    assert prep["wqkv"].shape == (H, E, 3 * Dh)
    assert prep["wo"].shape == (H, Dh, E)

    kernel = functools.partial(_mha_kernel, num_heads=H, head_size=Dh,
                               compute_dtype=compute_dtype)

    return pl.pallas_call(
        kernel,
        out_shape=jax.ShapeDtypeStruct((N, S, E), x.dtype),
        grid_spec=pltpu.PrefetchScalarGridSpec(
            num_scalar_prefetch=0,
            grid=(N,),                                   # >=2 steps: megacore-shardable
            in_specs=[
                pl.BlockSpec((None, S, E), lambda n: (n, 0, 0)),    # x (1 batch elem/step)
                pl.BlockSpec((H, E, 3 * Dh), lambda n: (0, 0, 0)),  # Wqkv (resident)
                pl.BlockSpec((H, 1, 3 * Dh), lambda n: (0, 0, 0)),  # bqkv
                pl.BlockSpec((H, Dh, E), lambda n: (0, 0, 0)),      # Wo
                pl.BlockSpec((1, E), lambda n: (0, 0)),             # bo
            ],
            out_specs=pl.BlockSpec((None, S, E), lambda n: (n, 0, 0)),
        ),
        compiler_params=pltpu.CompilerParams(
            dimension_semantics=("parallel",)),
    )(x.astype(compute_dtype), prep["wqkv"], prep["bqkv"], prep["wo"], prep["bo"])


def _reference(x, params, *, num_heads):
    """Pure-JAX reference mirroring the PyTorch forward (high-precision matmuls)."""
    N, S, E = x.shape
    Dh = E // num_heads
    hp = jax.lax.Precision.HIGHEST
    q = jnp.einsum('nse,ef->nsf', x, params["wq"], precision=hp) + params["bq"][0]
    k = jnp.einsum('nse,ef->nsf', x, params["wk"], precision=hp) + params["bk"][0]
    v = jnp.einsum('nse,ef->nsf', x, params["wv"], precision=hp) + params["bv"][0]
    outs = []
    for h in range(num_heads):
        sl = slice(h * Dh, (h + 1) * Dh)
        energy = jnp.einsum('nqd,nkd->nqk', q[..., sl], k[..., sl], precision=hp)
        attn = jax.nn.softmax(energy / (E ** 0.5), axis=2)
        outs.append(jnp.einsum('nql,nld->nqd', attn, v[..., sl], precision=hp))
    ctx = jnp.concatenate(outs, axis=-1)
    return jnp.einsum('nse,ef->nsf', ctx, params["wo"], precision=hp) + params["bo"][0]


def _init_params(key, embed_size, num_heads):
    """Deterministic synthetic parameters (combined per-head layout)."""
    ks = jax.random.split(key, 8)
    scale = 0.1
    E = embed_size
    return {
        # combined per-head Q/K/V weights, (in=E, out=E); column block h == head h
        "wq": scale * jax.random.normal(ks[0], (E, E), jnp.float32),
        "bq": scale * jax.random.normal(ks[1], (1, E), jnp.float32),
        "wk": scale * jax.random.normal(ks[2], (E, E), jnp.float32),
        "bk": scale * jax.random.normal(ks[3], (1, E), jnp.float32),
        "wv": scale * jax.random.normal(ks[4], (E, E), jnp.float32),
        "bv": scale * jax.random.normal(ks[5], (1, E), jnp.float32),
        "wo": scale * jax.random.normal(ks[6], (E, E), jnp.float32),
        "bo": scale * jax.random.normal(ks[7], (1, E), jnp.float32),
    }


if __name__ == "__main__":
    # Small shapes consistent with the module: batch=2, seq=8, embed=32, 4 heads.
    N, S, E = 2, 8, 32
    NUM_HEADS = 4

    key = jax.random.PRNGKey(0)
    kx, kp = jax.random.split(key)
    x = jax.random.normal(kx, (N, S, E), jnp.float32)
    params = _init_params(kp, E, NUM_HEADS)

    ref = _reference(x, params, num_heads=NUM_HEADS)

    # f32 path: exact softmax, f32 accumulation.  Residual tolerance only covers
    # DEFAULT-precision f32 MXU pass differences vs the HIGHEST-precision reference.
    prep_f32 = prepare_mha_params(params, num_heads=NUM_HEADS,
                                  compute_dtype=jnp.float32)
    out_f32 = multi_head_attention(x, prep_f32, num_heads=NUM_HEADS,
                                   compute_dtype=jnp.float32)
    out_f32 = jax.block_until_ready(out_f32)
    assert out_f32.shape == (N, S, E)
    assert jnp.allclose(out_f32, ref, atol=5e-3, rtol=2e-2), "f32 kernel mismatch"

    # bf16 operand path (recommended default on v6e/v7x): all four matmuls take
    # bf16 operands with f32 accumulation; softmax math stays f32.
    prep_bf16 = prepare_mha_params(params, num_heads=NUM_HEADS,
                                   compute_dtype=jnp.bfloat16)
    out_bf16 = multi_head_attention(x, prep_bf16, num_heads=NUM_HEADS,
                                    compute_dtype=jnp.bfloat16)
    out_bf16 = jax.block_until_ready(out_bf16)
    assert out_bf16.shape == (N, S, E)
    assert jnp.allclose(out_bf16, ref, atol=3e-2, rtol=5e-2), "bf16 kernel mismatch"

    print("KERNEL_OK")
</pallas_src>

<mosaic_0001>
module attributes {stable_mosaic.version = 11 : i64} {
  func.func @_mha_kernel(%arg0: i32, %arg1: memref<1x8x32xf32, #tpu.memory_space<vmem>>, %arg2: memref<4x32x24xf32, #tpu.memory_space<vmem>>, %arg3: memref<4x1x24xf32, #tpu.memory_space<vmem>>, %arg4: memref<4x8x32xf32, #tpu.memory_space<vmem>>, %arg5: memref<1x32xf32, #tpu.memory_space<vmem>>, %arg6: memref<1x8x32xf32, #tpu.memory_space<vmem>>) attributes {dimension_semantics = [#tpu.dimension_semantics<parallel>], iteration_bounds = array<i64: 2>, scalar_prefetch = 0 : i64, scratch_operands = 0 : i64, tpu.core_type = #tpu.core_type<tc>, window_params = [{transform_indices = @transform_0, window_bounds = array<i64: 1, 8, 32>}, {pipeline_mode = #tpu.pipeline_mode<synchronous>, transform_indices = @transform_1, window_bounds = array<i64: 4, 32, 24>}, {pipeline_mode = #tpu.pipeline_mode<synchronous>, transform_indices = @transform_2, window_bounds = array<i64: 4, 1, 24>}, {pipeline_mode = #tpu.pipeline_mode<synchronous>, transform_indices = @transform_3, window_bounds = array<i64: 4, 8, 32>}, {pipeline_mode = #tpu.pipeline_mode<synchronous>, transform_indices = @transform_4, window_bounds = array<i64: 1, 32>}, {transform_indices = @transform_5, window_bounds = array<i64: 1, 8, 32>}]} {
    %c0 = arith.constant 0 : index
    %c0_0 = arith.constant 0 : index
    %c0_1 = arith.constant 0 : index
    %0 = vector.load %arg1[%c0, %c0_0, %c0_1] : memref<1x8x32xf32, #tpu.memory_space<vmem>>, vector<1x8x32xf32>
    %1 = vector.shape_cast %0 : vector<1x8x32xf32> to vector<8x32xf32>
    %2 = vector.shape_cast %1 : vector<8x32xf32> to vector<1x8x32xf32>
    %3 = vector.broadcast %2 : vector<1x8x32xf32> to vector<4x8x32xf32>
    %c0_2 = arith.constant 0 : index
    %c0_3 = arith.constant 0 : index
    %c0_4 = arith.constant 0 : index
    %4 = vector.load %arg2[%c0_2, %c0_3, %c0_4] : memref<4x32x24xf32, #tpu.memory_space<vmem>>, vector<4x32x24xf32>
    "tpu.trace_start"() <{level = 10 : i32, message = "hse,hef->hsf"}> : () -> ()
    %cst = arith.constant dense<0.000000e+00> : vector<4x8x24xf32>
    %5 = tpu.matmul %3, %4, %cst {dimension_numbers = #tpu.dot_dimension_numbers<[2], [1], [1], [2], [0, 0, 0, 1, 1, 2], [0], [0]>} : vector<4x8x32xf32>, vector<4x32x24xf32>, vector<4x8x24xf32> -> vector<4x8x24xf32>
    "tpu.trace_stop"() : () -> ()
    %c0_5 = arith.constant 0 : index
    %c0_6 = arith.constant 0 : index
    %c0_7 = arith.constant 0 : index
    %6 = vector.load %arg3[%c0_5, %c0_6, %c0_7] : memref<4x1x24xf32, #tpu.memory_space<vmem>>, vector<4x1x24xf32>
    %7 = vector.broadcast %6 : vector<4x1x24xf32> to vector<4x8x24xf32>
    %8 = arith.addf %5, %7 : vector<4x8x24xf32>
    %9 = vector.extract_strided_slice %8 {offsets = [0, 0, 0], sizes = [4, 8, 8], strides = [1, 1, 1]} : vector<4x8x24xf32> to vector<4x8x8xf32>
    %10 = vector.extract_strided_slice %8 {offsets = [0, 0, 8], sizes = [4, 8, 8], strides = [1, 1, 1]} : vector<4x8x24xf32> to vector<4x8x8xf32>
    %11 = vector.extract_strided_slice %8 {offsets = [0, 0, 16], sizes = [4, 8, 8], strides = [1, 1, 1]} : vector<4x8x24xf32> to vector<4x8x8xf32>
    "tpu.trace_start"() <{level = 10 : i32, message = "hqd,hkd->hqk"}> : () -> ()
    %cst_8 = arith.constant dense<0.000000e+00> : vector<4x8x8xf32>
    %12 = tpu.matmul %9, %10, %cst_8 {dimension_numbers = #tpu.dot_dimension_numbers<[2], [2], [1], [1], [0, 0, 0, 1, 1, 1], [0], [0]>} : vector<4x8x8xf32>, vector<4x8x8xf32>, vector<4x8x8xf32> -> vector<4x8x8xf32>
    "tpu.trace_stop"() : () -> ()
    %cst_9 = arith.constant dense<0xFF800000> : vector<4x8xf32>
    %13 = vector.multi_reduction <maximumf>, %12, %cst_9 [2] : vector<4x8x8xf32> to vector<4x8xf32>
    %14 = vector.shape_cast %13 : vector<4x8xf32> to vector<4x8x1xf32>
    %15 = vector.broadcast %14 : vector<4x8x1xf32> to vector<4x8x8xf32>
    %16 = arith.subf %12, %15 : vector<4x8x8xf32>
    %17 = math.exp %16 : vector<4x8x8xf32>
    %cst_10 = arith.constant dense<0.000000e+00> : vector<4x8xf32>
    %18 = vector.multi_reduction <add>, %17, %cst_10 [2] : vector<4x8x8xf32> to vector<4x8xf32>
    %19 = vector.shape_cast %18 : vector<4x8xf32> to vector<4x8x1xf32>
    %20 = vector.broadcast %19 : vector<4x8x1xf32> to vector<4x8x8xf32>
    %21 = arith.divf %17, %20 : vector<4x8x8xf32>
    "tpu.trace_start"() <{level = 10 : i32, message = "hqk,hkd->hqd"}> : () -> ()
    %cst_11 = arith.constant dense<0.000000e+00> : vector<4x8x8xf32>
    %22 = tpu.matmul %21, %11, %cst_11 {dimension_numbers = #tpu.dot_dimension_numbers<[2], [1], [1], [2], [0, 0, 0, 1, 1, 2], [0], [0]>} : vector<4x8x8xf32>, vector<4x8x8xf32>, vector<4x8x8xf32> -> vector<4x8x8xf32>
    "tpu.trace_stop"() : () -> ()
    %c0_12 = arith.constant 0 : index
    %c0_13 = arith.constant 0 : index
    %c0_14 = arith.constant 0 : index
    %23 = vector.load %arg4[%c0_12, %c0_13, %c0_14] : memref<4x8x32xf32, #tpu.memory_space<vmem>>, vector<4x8x32xf32>
    "tpu.trace_start"() <{level = 10 : i32, message = "hqd,hde->hqe"}> : () -> ()
    %cst_15 = arith.constant dense<0.000000e+00> : vector<4x8x32xf32>
    %24 = tpu.matmul %22, %23, %cst_15 {dimension_numbers = #tpu.dot_dimension_numbers<[2], [1], [1], [2], [0, 0, 0, 1, 1, 2], [0], [0]>} : vector<4x8x8xf32>, vector<4x8x32xf32>, vector<4x8x32xf32> -> vector<4x8x32xf32>
    "tpu.trace_stop"() : () -> ()
    %25 = vector.extract_strided_slice %24 {offsets = [0, 0, 0], sizes = [1, 8, 32], strides = [1, 1, 1]} : vector<4x8x32xf32> to vector<1x8x32xf32>
    %26 = vector.shape_cast %25 : vector<1x8x32xf32> to vector<8x32xf32>
    %27 = vector.extract_strided_slice %24 {offsets = [1, 0, 0], sizes = [1, 8, 32], strides = [1, 1, 1]} : vector<4x8x32xf32> to vector<1x8x32xf32>
    %28 = vector.shape_cast %27 : vector<1x8x32xf32> to vector<8x32xf32>
    %29 = arith.addf %26, %28 : vector<8x32xf32>
    %30 = vector.extract_strided_slice %24 {offsets = [2, 0, 0], sizes = [1, 8, 32], strides = [1, 1, 1]} : vector<4x8x32xf32> to vector<1x8x32xf32>
    %31 = vector.shape_cast %30 : vector<1x8x32xf32> to vector<8x32xf32>
    %32 = arith.addf %29, %31 : vector<8x32xf32>
    %33 = vector.extract_strided_slice %24 {offsets = [3, 0, 0], sizes = [1, 8, 32], strides = [1, 1, 1]} : vector<4x8x32xf32> to vector<1x8x32xf32>
    %34 = vector.shape_cast %33 : vector<1x8x32xf32> to vector<8x32xf32>
    %35 = arith.addf %32, %34 : vector<8x32xf32>
    %c0_16 = arith.constant 0 : index
    %c0_17 = arith.constant 0 : index
    %36 = vector.load %arg5[%c0_16, %c0_17] : memref<1x32xf32, #tpu.memory_space<vmem>>, vector<1x32xf32>
    %37 = vector.broadcast %36 : vector<1x32xf32> to vector<8x32xf32>
    %38 = arith.addf %35, %37 : vector<8x32xf32>
    %c0_18 = arith.constant 0 : index
    %c0_19 = arith.constant 0 : index
    %c0_20 = arith.constant 0 : index
    %39 = vector.load %arg6[%c0_18, %c0_19, %c0_20] : memref<1x8x32xf32, #tpu.memory_space<vmem>>, vector<1x8x32xf32>
    %40 = vector.shape_cast %39 : vector<1x8x32xf32> to vector<8x32xf32>
    %41 = vector.shape_cast %38 : vector<8x32xf32> to vector<1x8x32xf32>
    tpu.vector_store %arg6[%c0_18, %c0_19, %c0_20], %41 {strides = array<i32>} : memref<1x8x32xf32, #tpu.memory_space<vmem>>, vector<1x8x32xf32>,
    return
  }
  func.func @transform_0(%arg0: i32) -> (i32, i32, i32) {
    %c0_i32 = arith.constant 0 : i32
    %c0_i32_0 = arith.constant 0 : i32
    %c0_i32_1 = arith.constant 0 : i32
    return %arg0, %c0_i32, %c0_i32_0 : i32, i32, i32
  }
  func.func @transform_1(%arg0: i32) -> (i32, i32, i32) {
    %c0_i32 = arith.constant 0 : i32
    %c0_i32_0 = arith.constant 0 : i32
    %c0_i32_1 = arith.constant 0 : i32
    %c0_i32_2 = arith.constant 0 : i32
    return %c0_i32, %c0_i32_0, %c0_i32_1 : i32, i32, i32
  }
  func.func @transform_2(%arg0: i32) -> (i32, i32, i32) {
    %c0_i32 = arith.constant 0 : i32
    %c0_i32_0 = arith.constant 0 : i32
    %c0_i32_1 = arith.constant 0 : i32
    %c0_i32_2 = arith.constant 0 : i32
    return %c0_i32, %c0_i32_0, %c0_i32_1 : i32, i32, i32
  }
  func.func @transform_3(%arg0: i32) -> (i32, i32, i32) {
    %c0_i32 = arith.constant 0 : i32
    %c0_i32_0 = arith.constant 0 : i32
    %c0_i32_1 = arith.constant 0 : i32
    %c0_i32_2 = arith.constant 0 : i32
    return %c0_i32, %c0_i32_0, %c0_i32_1 : i32, i32, i32
  }
  func.func @transform_4(%arg0: i32) -> (i32, i32) {
    %c0_i32 = arith.constant 0 : i32
    %c0_i32_0 = arith.constant 0 : i32
    %c0_i32_1 = arith.constant 0 : i32
    return %c0_i32, %c0_i32_0 : i32, i32
  }
  func.func @transform_5(%arg0: i32) -> (i32, i32, i32) {
    %c0_i32 = arith.constant 0 : i32
    %c0_i32_0 = arith.constant 0 : i32
    %c0_i32_1 = arith.constant 0 : i32
    return %arg0, %c0_i32, %c0_i32_0 : i32, i32, i32
  }
}

</mosaic_0001>

<bundles_post_ra>
// kernel: tpu_custom_call.1
= control target key start
LH: loop header
LB: loop body
LE: loop exit
PB: predicated region body
PF: predicated region fallthrough
CT: control target
= control target key end

     0   :  { %10 = vsyncpa [#allocation3], 0  ;;  %s1233_s0 = inlined_call_operand.vmem [shape: f32[2,8,32], index: 0, kind: input, shape index: {}]   ;;  %s1234_s1 = inlined_call_operand.vmem [shape: f32[4,32,24], index: 1, kind: input, shape index: {}]   ;;  %s1235_s2 = inlined_call_operand.vmem [shape: f32[4,1,24], index: 2, kind: input, shape index: {}]   ;;  %s1236_s3 = inlined_call_operand.vmem [shape: f32[4,8,32], index: 3, kind: input, shape index: {}]   ;;  %s1237_s4 = inlined_call_operand.vmem [shape: f32[1,32], index: 4, kind: input, shape index: {}]   ;;  %s1238_s5 = inlined_call_operand.hbm [shape: f32[2,8,32], index: 5, kind: output, shape index: {}]  }
   0x1   :  { %12 = vsyncpa [#allocation3 + $0x1], 0  ;;  %s1024_s18 = smov 0   ;;  %s1026_s19 = smov 0  }
   0x2   :  { %s1028_s20 = smov 0   ;;  %s1030_s21 = smov 0  }
   0x3 LB: > { %s1045_s22 = sadd.s32 4294967295, %s990_s21   ;;  %s826_s23 = sadd.s32 4294967294, %s990_s21   ;;  %s990_s21 = sphi %s1030_s21, %s1244_s21   ;;  %s986_s20 = sphi %s1028_s20, %s1243_s20   ;;  %s982_s19 = sphi %s1026_s19, %s1242_s19   ;;  %s978_s18 = sphi %s1024_s18, %s1241_s18  }
   0x4   : > { %s1049_s24 = sadd.s32 1, %s990_s21   ;;  %s135_s25 = sadd.s32 1, %s986_s20 }
   0x5   : > { %s132_s26 = ssub.s32 %s990_s21, %s1049_s24  ;;  %p145_p0 = scmp.ne.s32.totalorder %s986_s20, %s982_s19 }
   0x6   : > { %p133_p1 = scmp.eq.s32.totalorder %s132_s26, 0  ;;  %p146_p2 = scmp.eq.s32.totalorder %s1045_s22, 1 }
   0x7   : > { %p151_p3 = scmp.ne.s32.totalorder %s982_s19, %s978_s18  ;;  %p152_p4 = scmp.eq.s32.totalorder %s826_s23, 1 }
   0x8   : > { %s1060_s27 = scalar_select %p133_p1, %s986_s20, %s135_s25  }
   0x9   : > { %p1062_p5 = por %p146_p2, %p145_p0  ;;  %p1066_p6 = por %p152_p4, %p151_p3 }
   0xa   : > { %p829_p7 = scmp.ge.s32.totalorder %s990_s21, 1  ;;  %p189_p8 = scmp.lt.s32.totalorder %s990_s21, 3 }
   0xc   : > { %p190_p9 = pnand %p829_p7, %p189_p8 }
   0xd   : > { %p216_p10 = scmp.lt.s32.totalorder (!%p190_p9), %s1045_s22, 1  ;;  %s992_s12 = smov (!%p190_p9), 120  }
   0xe   : > { %193 = sbr.rel (%p190_p9) target bundleno = 958 (0x3be), region = 40  ;;  %s993_s25 = smov (!%p190_p9), 112  }
   0xf   : > { %s853_s14 = sshll.u32 (!%p190_p9), %s1045_s22, 3  ;;  %s948_s11 = scalar_lea.hbm (!%p190_p9), %s1238_s5, 16 }
  0x10   : > { %s762_s17 = scalar_lea.hbm (!%p190_p9), %s1238_s5, %s853_s14 }
  0x11   : > { %s766_s7 = sshll.u32 (!%p190_p9), %s762_s17, 4  ;;  %s767_s7 = int_to_ptr.hbm [resolvable:$true] %s766_s7 }
  0x12   : > { %s942_s8 = sshra.s32 (!%p190_p9), %s767_s7, 4  ;;  %s943_s8 = int_to_ptr.hbm [resolvable:$true] %s942_s8 }
  0x13   : > { %v224_v0 = vld [vmem:[%s1234_s1 + $0x18] sm:$0xff]  ;;  %v223_v3 = vld [vmem:[%s1234_s1 + $0x10] sm:$0xff]  ;;  %v222_v6 = vld [vmem:[%s1234_s1 + $0x8] sm:$0xff]  ;;  %s217_s30 = scalar_select %p216_p10, %s1045_s22, 1  ;;  %vm253_vm0 = vcmask 261120   ;;  %vm340_vm1 = vcmask 64512  }
  0x14   : > { %v228_v1 = vld [vmem:[%s1234_s1 + $0x38] sm:$0xff]  ;;  %269 = vmatpush.msra.mxu0 %v224_v0  ;;  %v227_v4 = vld [vmem:[%s1234_s1 + $0x30] sm:$0xff]  ;;  %v226_v7 = vld [vmem:[%s1234_s1 + $0x28] sm:$0xff]  ;;  %p949_p0 = scmp.lt.s32.totalorder %s943_s8, %s1238_s5 }
  0x15   : > { %v232_v2 = vld [vmem:[%s1234_s1 + $0x58] sm:$0xff]  ;;  %289 = vmatpush.msra.mxu1 %v228_v1  ;;  %v231_v5 = vld [vmem:[%s1234_s1 + $0x50] sm:$0xff]  ;;  %v230_v8 = vld [vmem:[%s1234_s1 + $0x48] sm:$0xff]  ;;  %s831_s16 = sshll.u32 %s217_s30, 3  ;;  %s944_s30 = scalar_lea.hbm %s943_s8, 8 }
  0x16   : > { %309 = vmatpush.msra.mxu2 %v232_v2  ;;  %270 = vmatpush.msra.mxu0 %v223_v3  ;;  %v236_v9 = vld [vmem:[%s1234_s1 + $0x78] sm:$0xff]  ;;  %v221_v10 = vld [vmem:[%s1234_s1] sm:$0xff]  ;;  %v235_v12 = vld [vmem:[%s1234_s1 + $0x70] sm:$0xff]  ;;  %s219_s6 = scalar_lea.vmem %s1233_s0, %s831_s16  ;;  %p945_p11 = scmp.ne.s32.totalorder %s943_s8, %s944_s30 }
  0x17   : > { %290 = vmatpush.msra.mxu1 %v227_v4  ;;  %329 = vmatpush.msra.mxu3 %v236_v9  ;;  %v225_v11 = vld [vmem:[%s1234_s1 + $0x20] sm:$0xff]  ;;  %v234_v15 = vld [vmem:[%s1234_s1 + $0x68] sm:$0xff]  ;;  %p950_p1 = scmp.lt.s32.totalorder %s948_s11, %s944_s30 }
  0x18   : > { %310 = vmatpush.msra.mxu2 %v231_v5  ;;  %271 = vmatpush.msra.mxu0 %v222_v6  ;;  %v229_v13 = vld [vmem:[%s1234_s1 + $0x40] sm:$0xff]  ;;  %p946_p12 = pnand %p945_p11, %p1062_p5 }
  0x19   : > { %291 = vmatpush.msra.mxu1 %v226_v7  ;;  %330 = vmatpush.msra.mxu3 %v235_v12  ;;  %v220_v14 = vld [vmem:[%s219_s6] sm:$0xff]  ;;  %p951_p2 = por %p950_p1, %p949_p0 }
  0x1a   : > { %311 = vmatpush.msra.mxu2 %v230_v8  ;;  %272 = vmatpush.msra.mxu0 %v221_v10  ;;  %v233_v16 = vld [vmem:[%s1234_s1 + $0x60] sm:$0xff]  ;;  %p947_p13 = pneg %p946_p12 }
  0x1b   : > { %292 = vmatpush.msra.mxu1 %v225_v11  ;;  %832 = vmatmul.msk.f32.vlgmr.msra.gmra.mxu0 %vm253_vm0, %v220_v14  ;;  %v907_v17 = vld [vmem:[%s1235_s2] ss:$0 sm:$0xff]  ;;  %v909_v20 = vld [vmem:[%s1235_s2 + $0x2] ss:$0 sm:$0xff]  ;;  %v908_v21 = vld [vmem:[%s1235_s2 + $0x1] ss:$0 sm:$0xff] }
  0x1c   : > { %312 = vmatpush.msra.mxu2 %v229_v13  ;;  %833 = vmatmul.msk.f32.vlgmr.msra.gmra.mxu1 %vm253_vm0, %v220_v14  ;;  %v910_v26 = vld [vmem:[%s1235_s2 + $0x3] ss:$0 sm:$0xff]  ;;  %p952_p3 = pnand %p951_p2, %p947_p13 }
  0x1d   : > { %834 = vmatmul.msk.f32.vlgmr.msra.gmra.mxu2 %vm253_vm0, %v220_v14  ;;  %331 = vmatpush.msra.mxu3 %v234_v15 }
  0x1f   : > { %332 = vmatpush.msra.mxu3 %v233_v16 }
  0x20   : > { %835 = vmatmul.msk.f32.vlgmr.msra.gmra.mxu3 %vm253_vm0, %v220_v14 }
  0x98   : > { %v274_v18 = vpop.f32.mrf.mxu0 }
  0x99   : > { %v275_v19 = vadd.f32 %v907_v17, %v274_v18  ;;  %v294_v22 = vpop.f32.mrf.mxu1 }
  0x9a   : > { %v295_v25 = vadd.f32 %v908_v21, %v294_v22 }
  0x9b   : > { %338 = vrot.lane.b32.xlu1 %v275_v19, %s992_s12 }
  0x9c   : > { %v902_v39 = vpack.i.bf16 %v295_v25, %v275_v19 }
  0xa0   : > { %v314_v23 = vpop.f32.mrf.mxu2 }
  0xa1   : > { %v1138_v24 = vadd.f32 %v909_v20, %v314_v23 }
  0xa3   : > { %393 = vrot.lane.b32.xlu0 %v1138_v24, %s992_s12  ;;  %366 = vrot.lane.b32.xlu1 %v295_v25, %s992_s12  ;;  %v334_v27 = vpop.f32.mrf.mxu3 }
  0xa4   : > { %v1144_v28 = vadd.f32 %v910_v26, %v334_v27 }
  0xa6   : > { %v897_v1 = vpack.i.bf16 %v1144_v28, %v1138_v24 }
  0xab   : > { %420 = vrot.lane.b32.xlu0 %v1144_v28, %s992_s12  ;;  %s213_s12 = sand.u32 1, %s982_s19  }
  0xac   : > { %s830_s13 = sshll.u32 %s213_s12, 3  ;;  %s752_s22 = scalar_lea.sflag [#allocation3], %s213_s12 }
  0xad   : > { %s215_s26 = scalar_lea.vmem [#allocation2], %s830_s13 }
  0xae   : > { %s764_s6 = sshll.u32 %s215_s26, 4  ;;  %s765_s6 = int_to_ptr.vmem [resolvable:$true] %s764_s6 }
 0x10d   : > { %v339_v29 = vpop.permute.xlu1 %338 }
 0x10e   : > { %836 = vmatpush.xpose.msk.msrb.mxu0 %vm340_vm1, %v339_v29 }
 0x111   : > { %837 = vmatmul.msk.f32.vlgmr.msrb.gmra.mxu0 %vm340_vm1, %v275_v19 }
 0x115   : > { %v394_v30 = vpop.permute.xlu0 %393  ;;  %v367_v31 = vpop.permute.xlu1 %366 }
 0x116   : > { %840 = vmatpush.xpose.msk.msrb.mxu2 %vm340_vm1, %v394_v30  ;;  %838 = vmatpush.xpose.msk.msrb.mxu1 %vm340_vm1, %v367_v31 }
 0x119   : > { %841 = vmatmul.msk.f32.vlgmr.msrb.gmra.mxu2 %vm340_vm1, %v1138_v24  ;;  %839 = vmatmul.msk.f32.vlgmr.msrb.gmra.mxu1 %vm340_vm1, %v295_v25 }
 0x11d   : > { %v421_v32 = vpop.permute.xlu0 %420 }
 0x11e   : > { %842 = vmatpush.xpose.msk.msrb.mxu3 %vm340_vm1, %v421_v32 }
 0x121   : > { %843 = vmatmul.msk.f32.vlgmr.msrb.gmra.mxu3 %vm340_vm1, %v1144_v28 }
 0x18e   : > { %v362_v33 = vpop.f32.mrf.mxu0 }
 0x18f   : > { %v446_v34 = vsel %vm340_vm1, %v362_v33, -inf }
 0x190   : > { %447 = vmax.xlane.f32.xlu0 %v446_v34 }
 0x196   : > { %v389_v35 = vpop.f32.mrf.mxu1 }
 0x197   : > { %v449_v36 = vsel %vm340_vm1, %v389_v35, -inf }
 0x198   : > { %450 = vmax.xlane.f32.xlu1 %v449_v36 }
 0x19c   : > { %v416_v37 = vpop.f32.mrf.mxu2 }
 0x19d   : > { %v452_v38 = vsel %vm340_vm1, %v416_v37, -inf }
 0x19e   : > { %453 = vmax.xlane.f32.xlu2 %v452_v38 }
 0x1a4   : > { %v443_v40 = vpop.f32.mrf.mxu3  ;;  %903 = vrot.lane.b32.xlu0 %v902_v39, %s993_s25 }
 0x1a5   : > { %v455_v41 = vsel %vm340_vm1, %v443_v40, -inf }
 0x1a6   : > { %456 = vmax.xlane.f32.xlu2 %v455_v41 }
 0x203   : > { %v448_v42 = vpop.xlane.xlu0 %447 }
 0x204   : > { %v458_v43 = vsub.f32 %v362_v33, %v448_v42 }
 0x206   : > { %v462_v44 = vmul.f32 1.442695, %v458_v43 }
 0x208   : > { %912 = vpow2.f32 %v462_v44 }
 0x20b   : > { %v451_v45 = vpop.xlane.xlu1 %450 }
 0x20c   : > { %v459_v46 = vsub.f32 %v389_v35, %v451_v45 }
 0x20e   : > { %v913_v47 = vpop.eup %912  ;;  %v464_v48 = vmul.f32 1.442695, %v459_v46 }
 0x20f   : > { %v470_v49 = vsel %vm340_vm1, %v913_v47, 0.0 }
 0x210   : > { %914 = vpow2.f32 %v464_v48  ;;  %471 = vadd.xlane.f32.xlu2 %v470_v49 }
 0x211   : > { %v454_v50 = vpop.xlane.xlu2 %453 }
 0x212   : > { %v460_v51 = vsub.f32 %v416_v37, %v454_v50 }
 0x214   : > { %v466_v52 = vmul.f32 1.442695, %v460_v51 }
 0x216   : > { %v915_v53 = vpop.eup %914  ;;  %916 = vpow2.f32 %v466_v52  ;;  %v904_v54 = vpop.permute.xlu0 %903 }
 0x217   : > { %v906_v55 = vunpack.i.h.bf16 %v904_v54  ;;  %v905_v56 = vunpack.i.l.bf16 %v904_v54  ;;  %v473_v57 = vsel %vm340_vm1, %v915_v53, 0.0  ;;  %v647_v54 = vld [vmem:[%s1236_s3 + $0x8] sm:$0xff] }
 0x218   : > { %474 = vadd.xlane.f32.xlu2 %v473_v57 }
 0x219   : > { %v457_v58 = vpop.xlane.xlu2 %456  ;;  %563 = vmatpush.msra.mxu0 %v905_v56  ;;  %589 = vmatpush.msra.mxu1 %v906_v55  ;;  %v648_v55 = vld [vmem:[%s1236_s3 + $0x10] sm:$0xff]  ;;  %v649_v56 = vld [vmem:[%s1236_s3 + $0x18] sm:$0xff] }
 0x21a   : > { %v461_v59 = vsub.f32 %v443_v40, %v457_v58 }
 0x21b   : > { %691 = vmatpush.msrb.mxu1 %v647_v54 }
 0x21c   : > { %v468_v60 = vmul.f32 1.442695, %v461_v59  ;;  %v1164_v61 = vpop.eup %916 }
 0x21d   : > { %v476_v62 = vsel %vm340_vm1, %v1164_v61, 0.0 }
 0x21e   : > { %918 = vpow2.f32 %v468_v60 }
 0x220   : > { %477 = vadd.xlane.f32.xlu2 %v476_v62 }
 0x224   : > { %v1168_v63 = vpop.eup %918 }
 0x225   : > { %v479_v0 = vsel %vm340_vm1, %v1168_v63, 0.0 }
 0x228   : > { %480 = vadd.xlane.f32.xlu2 %v479_v0 }
 0x240   : > { %898 = vrot.lane.b32.xlu2 %v897_v1, %s993_s25 }
 0x283   : > { %v472_v2 = vpop.xlane.xlu2 %471 }
 0x284   : > { %920 = vrcp.f32 %v472_v2  ;;  %v493_v7 = vand.u32 2147483648, %v472_v2  ;;  %v491_v9 = vand.u32 2147483647, %v472_v2  ;;  %vm487_vm3 = vweird.f32 %v472_v2 }
 0x286   : > { %v494_v12 = vor.u32 1.1754944e-38, %v493_v7  ;;  %vm492_vm5 = vcmp.eq.f32.partialorder %v491_v9, 8.507059e+37 }
 0x28a   : > { %v921_v3 = vpop.eup %920 }
 0x28b   : > { %v483_v4 = vmul.f32 %v921_v3, %v472_v2  ;;  %v475_v5 = vpop.xlane.xlu2 %474  ;;  %vm488_vm2 = vweird.f32 %v921_v3  ;;  %v911_v2 = vld [vmem:[%s1237_s4] ss:$0 sm:$0xff] }
 0x28c   : > { %922 = vrcp.f32 %v475_v5  ;;  %vm489_vm4 = vmor %vm487_vm3, %vm488_vm2  ;;  %v508_v19 = vand.u32 2147483648, %v475_v5  ;;  %v506_v21 = vand.u32 2147483647, %v475_v5  ;;  %vm502_vm7 = vweird.f32 %v475_v5 }
 0x28d   : > { %v484_v6 = vsub.f32 1.0, %v483_v4 }
 0x28e   : > { %v509_v24 = vor.u32 1.1754944e-38, %v508_v19  ;;  %vm507_vm9 = vcmp.eq.f32.partialorder %v506_v21, 8.507059e+37 }
 0x28f   : > { %v485_v8 = vmul.f32 %v921_v3, %v484_v6 }
 0x291   : > { %v486_v10 = vadd.f32 %v921_v3, %v485_v8 }
 0x292   : > { %v923_v11 = vpop.eup %922 }
 0x293   : > { %v490_v13 = vsel %vm489_vm4, %v921_v3, %v486_v10  ;;  %v498_v14 = vmul.f32 %v923_v11, %v475_v5  ;;  %v478_v15 = vpop.xlane.xlu2 %477  ;;  %vm503_vm6 = vweird.f32 %v923_v11 }
 0x294   : > { %v495_v16 = vsel %vm492_vm5, %v494_v12, %v490_v13  ;;  %924 = vrcp.f32 %v478_v15  ;;  %vm504_vm8 = vmor %vm502_vm7, %vm503_vm6  ;;  %v523_v31 = vand.u32 2147483648, %v478_v15  ;;  %v521_v33 = vand.u32 2147483647, %v478_v15 }
 0x295   : > { %v499_v17 = vsub.f32 1.0, %v498_v14  ;;  %v496_v18 = vmul.f32 %v913_v47, %v495_v16  ;;  %vm517_vm11 = vweird.f32 %v478_v15 }
 0x296   : > { %v524_v36 = vor.u32 1.1754944e-38, %v523_v31  ;;  %vm522_vm13 = vcmp.eq.f32.partialorder %v521_v33, 8.507059e+37 }
 0x297   : > { %v500_v20 = vmul.f32 %v923_v11, %v499_v17  ;;  %844 = vmatmul.msk.f32.vlgmr.msra.gmra.mxu0 %vm340_vm1, %v496_v18 }
 0x299   : > { %v501_v22 = vadd.f32 %v923_v11, %v500_v20 }
 0x29a   : > { %v925_v23 = vpop.eup %924 }
 0x29b   : > { %v505_v25 = vsel %vm504_vm8, %v923_v11, %v501_v22  ;;  %v513_v26 = vmul.f32 %v925_v23, %v478_v15  ;;  %v481_v27 = vpop.xlane.xlu2 %480  ;;  %vm518_vm10 = vweird.f32 %v925_v23 }
 0x29c   : > { %v510_v28 = vsel %vm507_vm9, %v509_v24, %v505_v25  ;;  %926 = vrcp.f32 %v481_v27  ;;  %vm519_vm12 = vmor %vm517_vm11, %vm518_vm10  ;;  %v538_v45 = vand.u32 2147483648, %v481_v27  ;;  %v536_v47 = vand.u32 2147483647, %v481_v27 }
 0x29d   : > { %v514_v29 = vsub.f32 1.0, %v513_v26  ;;  %v511_v30 = vmul.f32 %v915_v53, %v510_v28  ;;  %vm532_vm15 = vweird.f32 %v481_v27  ;;  %v646_v53 = vld [vmem:[%s1236_s3] sm:$0xff] }
 0x29e   : > { %v539_v49 = vor.u32 1.1754944e-38, %v538_v45  ;;  %vm537_vm3 = vcmp.eq.f32.partialorder %v536_v47, 8.507059e+37  ;;  %668 = vmatpush.msrb.mxu0 %v646_v53 }
 0x29f   : > { %v515_v32 = vmul.f32 %v925_v23, %v514_v29  ;;  %845 = vmatmul.msk.f32.vlgmr.msra.gmra.mxu1 %vm340_vm1, %v511_v30 }
 0x2a1   : > { %v516_v34 = vadd.f32 %v925_v23, %v515_v32 }
 0x2a2   : > { %v927_v35 = vpop.eup %926 }
 0x2a3   : > { %v520_v37 = vsel %vm519_vm12, %v925_v23, %v516_v34  ;;  %v528_v38 = vmul.f32 %v927_v35, %v481_v27  ;;  %v899_v39 = vpop.permute.xlu2 %898  ;;  %vm533_vm14 = vweird.f32 %v927_v35 }
 0x2a4   : > { %v525_v40 = vsel %vm522_vm13, %v524_v36, %v520_v37  ;;  %v901_v41 = vunpack.i.h.bf16 %v899_v39  ;;  %v900_v42 = vunpack.i.l.bf16 %v899_v39  ;;  %vm534_vm2 = vmor %vm532_vm15, %vm533_vm14 }
 0x2a5   : > { %v529_v43 = vsub.f32 1.0, %v528_v38  ;;  %v526_v44 = vmul.f32 %v1164_v61, %v525_v40 }
 0x2a6   : > { %615 = vmatpush.msra.mxu2 %v900_v42  ;;  %641 = vmatpush.msra.mxu3 %v901_v41 }
 0x2a7   : > { %v530_v46 = vmul.f32 %v927_v35, %v529_v43  ;;  %846 = vmatmul.msk.f32.vlgmr.msra.gmra.mxu2 %vm340_vm1, %v526_v44 }
 0x2a8   : > { %714 = vmatpush.msrb.mxu2 %v648_v55  ;;  %737 = vmatpush.msrb.mxu3 %v649_v56 }
 0x2a9   : > { %v531_v48 = vadd.f32 %v927_v35, %v530_v46 }
 0x2ab   : > { %v535_v50 = vsel %vm534_vm2, %v927_v35, %v531_v48 }
 0x2ac   : > { %v540_v51 = vsel %vm537_vm3, %v539_v49, %v535_v50 }
 0x2ad   : > { %v541_v52 = vmul.f32 %v1168_v63, %v540_v51 }
 0x2af   : > { %847 = vmatmul.msk.f32.vlgmr.msra.gmra.mxu3 %vm340_vm1, %v541_v52 }
 0x314   : > { %v565_v57 = vpop.f32.mrf.mxu0 }
 0x315   : > { %848 = vmatmul.msk.f32.vlgmr.msrb.gmra.mxu0 %vm340_vm1, %v565_v57 }
 0x31c   : > { %v591_v58 = vpop.f32.mrf.mxu1 }
 0x31d   : > { %849 = vmatmul.msk.f32.vlgmr.msrb.gmra.mxu1 %vm340_vm1, %v591_v58 }
 0x32a   : > { %v617_v59 = vpop.f32.mrf.mxu2 }
 0x32b   : > { %850 = vmatmul.msk.f32.vlgmr.msrb.gmra.mxu2 %vm340_vm1, %v617_v59 }
 0x332   : > { %v643_v60 = vpop.f32.mrf.mxu3 }
 0x333   : > { %851 = vmatmul.msk.f32.vlgmr.msrb.gmra.mxu3 %vm340_vm1, %v643_v60 }
 0x392   : > { %v670_v62 = vpop.f32.mrf.mxu0 }
 0x39a   : > { %v693_v61 = vpop.f32.mrf.mxu1 }
 0x39b   : > { %v742_v0 = vadd.f32 %v693_v61, %v670_v62 }
 0x3ae   : > { %v716_v63 = vpop.f32.mrf.mxu2 }
 0x3af   : > { %v743_v1 = vadd.f32 %v742_v0, %v716_v63 }
 0x3b6   : > { %v739_v3 = vpop.f32.mrf.mxu3 }
 0x3b7   : > { %v744_v4 = vadd.f32 %v743_v1, %v739_v3 }
 0x3b9   : > { %v749_v5 = vadd.f32 %v911_v2, %v744_v4 }
 0x3bb   : > { %750 = vst.msk [vmem:[%s215_s26] sm:$0xff] %vm253_vm0, %v749_v5 }
 0x3bc   : > { %955 = shalt.err (!%p952_p3)
}
 0x3bd   : > { %856 = dma.vmem_to_hbm [thread:$0]  (%p1062_p5), %s765_s6, 128, %s767_s7, %s752_s22  }
 0x3be PF: > { %p862_p4 = scmp.ge.s32.totalorder %s990_s21, 2  ;;  %s778_s12 = sand.u32 1, %s978_s18  }
 0x3bf   : > { %s779_s15 = scalar_lea.sflag [#allocation3], %s778_s12 }
 0x3c0   : > { %p859_p7 = pnand %p862_p4, %p1066_p6 }
 0x3c2   : > { %p860_p8 = pneg %p859_p7 }
 0x3c4   : > { %973 = dma.done.wait (%p860_p8), %s779_s15, 128  }
 0x3c5   : > { %975 = vsyncadd (%p860_p8), %s779_s15, 4294967168  ;;  %p15_p9 = scmp.ge.s32.totalorder %s1049_s24, 4   ;;  %s1241_s18 = smov %s982_s19 }
 0x3c6   : > { %s1242_s19 = smov %s986_s20  ;;  %s1243_s20 = smov %s1060_s27 }
 0x3c7   : > { %s1244_s21 = smov %s1049_s24  ;;  %17 = sbr.rel (!%p15_p9) target bundleno = 3 (0x3), region = 75 }
 0x3cc   :  { %785 = vsyncpa [#allocation3], 1 }
 0x3cd   :  { %787 = vsyncpa [#allocation3 + $0x1], 1 }

</bundles_post_ra>
